<compile_context>
chip_gen: v5e
topology: v5e:2x2
jax: 0.10.0
libtpu: 0.0.40
codegen_flags: <defaults>
</compile_context>

<pallas_src>
import functools
import math

import numpy as np
import jax
import jax.numpy as jnp
from jax.experimental import pallas as pl
from jax.experimental.pallas import tpu as pltpu


def _round_up(x, m):
    return (x + m - 1) // m * m


def _cheb_term_kernel(gso_ref, gso2_ref, bias_ref, y_ref, out_ref, *, Ks):
    """out = sum_k T_k(gso) @ Y_k + bias for one tile of the B*T axis.

    gso_ref:  (Np, Np)                  graph shift operator (resident across the grid)
    gso2_ref: (Np, Np)                  2 * gso (resident; avoids a per-step VPU multiply)
    bias_ref: (1, c_out*tile)           bias, pre-broadcast along the fused (c_out, tile) lanes
    y_ref:    (Ks, 1, Np, c_out*tile)   pre-mixed inputs Y_k = x_al @ (W_k + delta_{k0} I)
    out_ref:  (1, Np, c_out*tile)       output block (lane-dense: c_out*tile lanes)
    """
    gso = gso_ref[...]
    cdt = gso.dtype

    # k = 0: T_0(gso) = I, so the contribution is Y_0 itself.  Y_0 already carries the
    # GraphConvLayer residual (the wrapper folded +I into the k=0 weight).
    acc = y_ref[0, 0].astype(jnp.float32)

    if Ks >= 2:
        gso2 = gso2_ref[...]
        for k in range(1, Ks):
            yk = y_ref[k, 0]
            # T_1 Y_k = gso @ Y_k   -- one wide (Np, Np) @ (Np, c_out*tile) MXU matmul
            t_km1 = jnp.dot(gso, yk.astype(cdt), preferred_element_type=jnp.float32)
            t_km2 = yk.astype(jnp.float32)                      # T_0 Y_k
            for _ in range(2, k + 1):                           # T_j = 2 gso T_{j-1} - T_{j-2}
                t_k = jnp.dot(gso2, t_km1.astype(cdt),
                              preferred_element_type=jnp.float32) - t_km2
                t_km2, t_km1 = t_km1, t_k
            acc = acc + t_km1

    out_ref[0] = (acc + bias_ref[...]).astype(out_ref.dtype)


def _pick_tile_and_vmem(M, Np, Ks, c_out, in_bytes, out_bytes, tile_m):
    """Generation-aware B*T tile + explicit vmem limit."""
    # VMEM bytes needed per B*T column of a tile:
    per_col = Np * c_out * (Ks * in_bytes * 2      # double-buffered pre-mixed input block
                            + out_bytes * 2        # double-buffered output block
                            + 4 * 3)               # f32 live temporaries (acc, T_{j-1}, T_{j-2})
    try:
        cap = int(pltpu.get_tpu_info().vmem_capacity_bytes)
    except Exception:                              # fallback: v7x per-core VMEM
        cap = 64 * 1024 * 1024
    budget = int(cap * 0.4)
    tile = max(128, min(2048, (budget // max(per_col, 1)) // 128 * 128))
    if tile_m is not None:
        tile = max(128, min(tile, (tile_m // 128) * 128))
    tile = min(tile, _round_up(M, 128))
    # Keep >= 2 grid steps when there is enough work so v7x's two TensorCores both get a share.
    if M > 128 and _round_up(M, tile) // tile < 2:
        tile = max(128, _round_up((M + 1) // 2, 128))
    resident = 2 * Np * Np * in_bytes + 4 * c_out * tile
    need = per_col * tile + resident + (4 << 20)
    vmem_limit = int(min(max(need, 32 << 20), int(cap * 0.9)))
    return tile, vmem_limit


def graph_conv_layer(x, gso, cheb_weight, cheb_bias,
                     align_weight=None, align_bias=None,
                     *, tile_m=None, compute_dtype=jnp.bfloat16,
                     out_dtype=jnp.float32):
    """Forward of STGCN GraphConvLayer (Align -> ChebGraphConv -> +residual).

    x:           (B, c_in, T, N)
    gso:         (N, N)
    cheb_weight: (Ks, c_out, c_out)
    cheb_bias:   (c_out,)
    align_weight/bias: 1x1-conv params, only used when c_in > c_out
    returns:     (B, c_out, T, N)
    """
    B, c_in, T, Nn = x.shape
    Ks, c_mid, c_out = cheb_weight.shape
    assert c_mid == c_out, "ChebGraphConv inside GraphConvLayer is square (c_out -> c_out)"

    # --- Residual fold: T_0(gso) = I, so adding I to the k=0 weight adds x_al exactly.
    w_fold = cheb_weight.at[0].add(jnp.eye(c_out, dtype=cheb_weight.dtype))

    # --- Align.  c_in > c_out: 1x1 conv (tiny channel-only op, XLA glue).
    #     c_in <= c_out: the zero channel pad is folded away by dropping weight rows.
    if c_in > c_out:
        if align_weight is None or align_bias is None:
            raise ValueError("align_weight/align_bias required when c_in > c_out")
        # TODO(synk): the align 1x1 conv could be folded into w_eff (align_weight.T @ W_k)
        # to skip this extra XLA pass; kept explicit for clarity.
        x_src = (jnp.einsum('bitn,oi->botn', x, align_weight)
                 + align_bias[None, :, None, None])
        w_eff = w_fold                                        # (Ks, c_out, c_out)
    else:
        x_src = x
        w_eff = w_fold[:, :c_in, :]                           # (Ks, c_in, c_out)

    M = B * T
    Np = _round_up(Nn, 8)
    in_bytes = jnp.dtype(compute_dtype).itemsize
    out_bytes = jnp.dtype(out_dtype).itemsize
    tile, vmem_limit = _pick_tile_and_vmem(M, Np, Ks, c_out, in_bytes, out_bytes, tile_m)
    Mp = _round_up(M, tile)
    n_tiles = Mp // tile

    # --- Channel pre-mix in XLA:  Y[k, h, j, m] = sum_i x_src[b, i, t, h] * w_eff[k, i, j]
    #     with m = b*T + t.  This replaces the in-kernel (Ks*c_in -> c_out) contraction and
    #     the Chebyshev VMEM stack; the kernel only does wide gso matmuls on Y_k.
    # TODO(synk): if upstream already produces x in (N, C, B*T) layout this premix/relayout
    # pass could be fused into the producing op to cut wrapper HBM traffic.
    y = jnp.einsum('bitn,kio->knobt',
                   x_src.astype(jnp.float32), w_eff.astype(jnp.float32))
    y = y.reshape(Ks, Nn, c_out, M)
    y = jnp.pad(y, ((0, 0), (0, Np - Nn), (0, 0), (0, Mp - M)))     # exact zero padding
    y = y.reshape(Ks, Np, c_out, n_tiles, tile)
    y = jnp.transpose(y, (0, 3, 1, 2, 4)).reshape(Ks, n_tiles, Np, c_out * tile)
    y = y.astype(compute_dtype)

    gso_p = jnp.pad(gso, ((0, Np - Nn), (0, Np - Nn))).astype(jnp.float32)
    gso_c = gso_p.astype(compute_dtype)
    gso2_c = (2.0 * gso_p).astype(compute_dtype)
    bias_row = jnp.repeat(cheb_bias.astype(jnp.float32), tile).reshape(1, c_out * tile)

    out_p = pl.pallas_call(
        functools.partial(_cheb_term_kernel, Ks=Ks),
        out_shape=jax.ShapeDtypeStruct((n_tiles, Np, c_out * tile), out_dtype),
        grid=(n_tiles,),
        in_specs=[
            pl.BlockSpec((Np, Np), lambda t: (0, 0)),                       # gso   (resident)
            pl.BlockSpec((Np, Np), lambda t: (0, 0)),                       # 2*gso (resident)
            pl.BlockSpec((1, c_out * tile), lambda t: (0, 0)),              # bias  (resident)
            pl.BlockSpec((Ks, 1, Np, c_out * tile), lambda t: (0, t, 0, 0)),  # Y tile over B*T
        ],
        out_specs=pl.BlockSpec((1, Np, c_out * tile), lambda t: (t, 0, 0)),
        compiler_params=pltpu.CompilerParams(
            dimension_semantics=("parallel",),
            vmem_limit_bytes=vmem_limit),
    )(gso_c, gso2_c, bias_row, y)

    # --- back to the PyTorch GraphConvLayer output layout (B, c_out, T, N)
    o = out_p.reshape(n_tiles, Np, c_out, tile)
    o = jnp.transpose(o, (2, 0, 3, 1)).reshape(c_out, Mp, Np)[:, :M, :Nn]
    o = o.reshape(c_out, B, T, Nn)
    return jnp.transpose(o, (1, 0, 2, 3))


def graph_conv_layer_reference(x, gso, cheb_weight, cheb_bias,
                               align_weight=None, align_bias=None):
    """Pure-JAX transcription of the PyTorch GraphConvLayer forward."""
    B, c_in, T, Nn = x.shape
    Ks, _, c_out = cheb_weight.shape
    if c_in > c_out:
        x_al = jnp.einsum('bitn,oi->botn', x, align_weight) + align_bias[None, :, None, None]
    elif c_in < c_out:
        x_al = jnp.concatenate(
            [x, jnp.zeros((B, c_out - c_in, T, Nn), dtype=x.dtype)], axis=1)
    else:
        x_al = x
    xp = jnp.transpose(x_al, (0, 2, 3, 1))                         # (B, T, N, C)
    x_list = [xp]
    if Ks >= 2:
        x_list.append(jnp.einsum('hi,btij->bthj', gso, xp))
    for k in range(2, Ks):
        x_list.append(jnp.einsum('hi,btij->bthj', 2.0 * gso, x_list[k - 1]) - x_list[k - 2])
    xs = jnp.stack(x_list, axis=2)                                 # (B, T, Ks, N, C)
    cheb = jnp.einsum('btkhi,kij->bthj', xs, cheb_weight) + cheb_bias
    return jnp.transpose(cheb, (0, 3, 1, 2)) + x_al                # (B, c_out, T, N)


if __name__ == "__main__":
    # small shapes consistent with the module: x is NCHW = (batch, c_in, time, nodes)
    B, c_in, T, Nn = 2, 4, 8, 16
    c_out, Ks = 8, 3

    key = jax.random.PRNGKey(0)
    k_w, k_b, k_x, k_g = jax.random.split(key, 4)

    # deterministic parameter init mirroring reset_parameters() bounds
    fan_in = c_out * c_out
    bound = 1.0 / math.sqrt(fan_in)
    cheb_weight = jax.random.uniform(k_w, (Ks, c_out, c_out), jnp.float32, -bound, bound)
    cheb_bias = jax.random.uniform(k_b, (c_out,), jnp.float32, -bound, bound)

    x = jax.random.normal(k_x, (B, c_in, T, Nn), dtype=jnp.float32)
    g = jax.random.normal(k_g, (Nn, Nn), dtype=jnp.float32)
    gso = (g + g.T) / (2.0 * Nn)                        # small symmetric graph shift operator

    ref = graph_conv_layer_reference(x, gso, cheb_weight, cheb_bias)

    # default bf16 MXU path
    out = jax.block_until_ready(graph_conv_layer(x, gso, cheb_weight, cheb_bias))
    assert out.shape == (B, c_out, T, Nn)
    np.testing.assert_allclose(np.asarray(out), np.asarray(ref), rtol=2e-2, atol=2e-2)

    # strict f32 path
    out32 = jax.block_until_ready(
        graph_conv_layer(x, gso, cheb_weight, cheb_bias, compute_dtype=jnp.float32))
    np.testing.assert_allclose(np.asarray(out32), np.asarray(ref), rtol=1e-2, atol=1e-2)

    print("KERNEL_OK")
</pallas_src>

<mosaic_0001>
module attributes {stable_mosaic.version = 11 : i64} {
  func.func @_cheb_term_kernel(%arg0: i32, %arg1: memref<16x16xbf16, #tpu.memory_space<vmem>>, %arg2: memref<16x16xbf16, #tpu.memory_space<vmem>>, %arg3: memref<1x1024xf32, #tpu.memory_space<vmem>>, %arg4: memref<3x1x16x1024xbf16, #tpu.memory_space<vmem>>, %arg5: memref<1x16x1024xf32, #tpu.memory_space<vmem>>) attributes {dimension_semantics = [#tpu.dimension_semantics<parallel>], iteration_bounds = array<i64: 1>, scalar_prefetch = 0 : i64, scratch_operands = 0 : i64, tpu.core_type = #tpu.core_type<tc>, window_params = [{pipeline_mode = #tpu.pipeline_mode<synchronous>, transform_indices = @transform_0, window_bounds = array<i64: 16, 16>}, {pipeline_mode = #tpu.pipeline_mode<synchronous>, transform_indices = @transform_1, window_bounds = array<i64: 16, 16>}, {pipeline_mode = #tpu.pipeline_mode<synchronous>, transform_indices = @transform_2, window_bounds = array<i64: 1, 1024>}, {transform_indices = @transform_3, window_bounds = array<i64: 3, 1, 16, 1024>}, {transform_indices = @transform_4, window_bounds = array<i64: 1, 16, 1024>}]} {
    %c0 = arith.constant 0 : index
    %c0_0 = arith.constant 0 : index
    %0 = vector.load %arg1[%c0, %c0_0] : memref<16x16xbf16, #tpu.memory_space<vmem>>, vector<16x16xbf16>
    %c0_1 = arith.constant 0 : index
    %c0_2 = arith.constant 0 : index
    %c0_3 = arith.constant 0 : index
    %c0_4 = arith.constant 0 : index
    %1 = vector.load %arg4[%c0_1, %c0_2, %c0_3, %c0_4] : memref<3x1x16x1024xbf16, #tpu.memory_space<vmem>>, vector<1x1x16x1024xbf16>
    %2 = vector.shape_cast %1 : vector<1x1x16x1024xbf16> to vector<16x1024xbf16>
    %3 = arith.extf %2 : vector<16x1024xbf16> to vector<16x1024xf32>
    %c0_5 = arith.constant 0 : index
    %c0_6 = arith.constant 0 : index
    %4 = vector.load %arg2[%c0_5, %c0_6] : memref<16x16xbf16, #tpu.memory_space<vmem>>, vector<16x16xbf16>
    %c1 = arith.constant 1 : index
    %c0_7 = arith.constant 0 : index
    %c0_8 = arith.constant 0 : index
    %c0_9 = arith.constant 0 : index
    %5 = vector.load %arg4[%c1, %c0_7, %c0_8, %c0_9] : memref<3x1x16x1024xbf16, #tpu.memory_space<vmem>>, vector<1x1x16x1024xbf16>
    %6 = vector.shape_cast %5 : vector<1x1x16x1024xbf16> to vector<16x1024xbf16>
    %cst = arith.constant dense<0.000000e+00> : vector<16x1024xf32>
    %7 = tpu.matmul %0, %6, %cst {dimension_numbers = #tpu.dot_dimension_numbers<[1], [0], [0], [1], [0, 0, 1, 1], [], []>} : vector<16x16xbf16>, vector<16x1024xbf16>, vector<16x1024xf32> -> vector<16x1024xf32>
    %8 = arith.addf %3, %7 : vector<16x1024xf32>
    %c2 = arith.constant 2 : index
    %c0_10 = arith.constant 0 : index
    %c0_11 = arith.constant 0 : index
    %c0_12 = arith.constant 0 : index
    %9 = vector.load %arg4[%c2, %c0_10, %c0_11, %c0_12] : memref<3x1x16x1024xbf16, #tpu.memory_space<vmem>>, vector<1x1x16x1024xbf16>
    %10 = vector.shape_cast %9 : vector<1x1x16x1024xbf16> to vector<16x1024xbf16>
    %cst_13 = arith.constant dense<0.000000e+00> : vector<16x1024xf32>
    %11 = tpu.matmul %0, %10, %cst_13 {dimension_numbers = #tpu.dot_dimension_numbers<[1], [0], [0], [1], [0, 0, 1, 1], [], []>} : vector<16x16xbf16>, vector<16x1024xbf16>, vector<16x1024xf32> -> vector<16x1024xf32>
    %12 = arith.extf %10 : vector<16x1024xbf16> to vector<16x1024xf32>
    %13 = arith.truncf %11 : vector<16x1024xf32> to vector<16x1024xbf16>
    %cst_14 = arith.constant dense<0.000000e+00> : vector<16x1024xf32>
    %14 = tpu.matmul %4, %13, %cst_14 {dimension_numbers = #tpu.dot_dimension_numbers<[1], [0], [0], [1], [0, 0, 1, 1], [], []>} : vector<16x16xbf16>, vector<16x1024xbf16>, vector<16x1024xf32> -> vector<16x1024xf32>
    %15 = arith.subf %14, %12 : vector<16x1024xf32>
    %16 = arith.addf %8, %15 : vector<16x1024xf32>
    %c0_15 = arith.constant 0 : index
    %c0_16 = arith.constant 0 : index
    %17 = vector.load %arg3[%c0_15, %c0_16] : memref<1x1024xf32, #tpu.memory_space<vmem>>, vector<1x1024xf32>
    %18 = vector.broadcast %17 : vector<1x1024xf32> to vector<16x1024xf32>
    %19 = arith.addf %16, %18 : vector<16x1024xf32>
    %c0_17 = arith.constant 0 : index
    %c0_18 = arith.constant 0 : index
    %c0_19 = arith.constant 0 : index
    %20 = vector.load %arg5[%c0_17, %c0_18, %c0_19] : memref<1x16x1024xf32, #tpu.memory_space<vmem>>, vector<1x16x1024xf32>
    %21 = vector.shape_cast %20 : vector<1x16x1024xf32> to vector<16x1024xf32>
    %22 = vector.shape_cast %19 : vector<16x1024xf32> to vector<1x16x1024xf32>
    tpu.vector_store %arg5[%c0_17, %c0_18, %c0_19], %22 {strides = array<i32>} : memref<1x16x1024xf32, #tpu.memory_space<vmem>>, vector<1x16x1024xf32>,
    return
  }
  func.func @transform_0(%arg0: i32) -> (i32, i32) {
    %c0_i32 = arith.constant 0 : i32
    %c0_i32_0 = arith.constant 0 : i32
    %c0_i32_1 = arith.constant 0 : i32
    return %c0_i32, %c0_i32_0 : i32, i32
  }
  func.func @transform_1(%arg0: i32) -> (i32, i32) {
    %c0_i32 = arith.constant 0 : i32
    %c0_i32_0 = arith.constant 0 : i32
    %c0_i32_1 = arith.constant 0 : i32
    return %c0_i32, %c0_i32_0 : i32, i32
  }
  func.func @transform_2(%arg0: i32) -> (i32, i32) {
    %c0_i32 = arith.constant 0 : i32
    %c0_i32_0 = arith.constant 0 : i32
    %c0_i32_1 = arith.constant 0 : i32
    return %c0_i32, %c0_i32_0 : i32, i32
  }
  func.func @transform_3(%arg0: i32) -> (i32, i32, i32, i32) {
    %c0_i32 = arith.constant 0 : i32
    %c0_i32_0 = arith.constant 0 : i32
    %c0_i32_1 = arith.constant 0 : i32
    %c0_i32_2 = arith.constant 0 : i32
    return %c0_i32, %arg0, %c0_i32_0, %c0_i32_1 : i32, i32, i32, i32
  }
  func.func @transform_4(%arg0: i32) -> (i32, i32, i32) {
    %c0_i32 = arith.constant 0 : i32
    %c0_i32_0 = arith.constant 0 : i32
    %c0_i32_1 = arith.constant 0 : i32
    return %arg0, %c0_i32, %c0_i32_0 : i32, i32, i32
  }
}

</mosaic_0001>

<bundles_post_ra>
// kernel: tpu_custom_call.1
= control target key start
LH: loop header
LB: loop body
LE: loop exit
PB: predicated region body
PF: predicated region fallthrough
CT: control target
= control target key end

     0   :  { %9 = vsyncpa [#allocation3], 0  ;;  %s1109_s0 = inlined_call_operand.hbm [shape: bf16[16,16], index: 0, kind: input, shape index: {}]   ;;  %s1110_s1 = inlined_call_operand.hbm [shape: bf16[16,16], index: 1, kind: input, shape index: {}]   ;;  %s1111_s2 = inlined_call_operand.hbm [shape: f32[1,1024], index: 2, kind: input, shape index: {}]   ;;  %s1112_s3 = inlined_call_operand.hbm [shape: bf16[3,1,16,1024], index: 3, kind: input, shape index: {}]   ;;  %s1113_s4 = inlined_call_operand.hbm [shape: f32[1,16,1024], index: 4, kind: output, shape index: {}]  }
   0x1   :  { %10 = vsyncpa [#allocation6], 0 }
   0x2   :  { %11 = vsyncpa [#allocation9], 0 }
   0x3   :  { %12 = vsyncpa [#allocation4], 0  ;;  %s30_s17 = sshll.u32 %s1110_s1, 4  ;;  %s954_s18 = smov [#allocation5]   ;;  %s31_s17 = int_to_ptr.hbm [resolvable:$true] %s30_s17 }
   0x4   :  { %s32_s19 = sshll.u32 %s954_s18, 4  ;;  %s17_s22 = sshll.u32 %s1109_s0, 4  ;;  %s33_s19 = int_to_ptr.vmem [resolvable:$true] %s32_s19  ;;  %s18_s22 = int_to_ptr.hbm [resolvable:$true] %s17_s22 }
   0x5   :  { %s955_s23 = smov 64   ;;  %s956_s24 = smov 4  }
   0x6   :  { %38 = dma.hbm_to_vmem [thread:$0]  %s31_s17, 128, %s33_s19, [#allocation6], %s955_s23, %s955_s23, %s956_s24  }
   0x7   :  { %s957_s25 = smov [#allocation2]   ;;  %s44_s1 = sshll.u32 %s1111_s2, 4  ;;  %s45_s1 = int_to_ptr.hbm [resolvable:$true] %s44_s1 }
   0x8   :  { %s19_s26 = sshll.u32 %s957_s25, 4  ;;  %s54_s0 = sshll.u32 %s1112_s3, 4  ;;  %s20_s26 = int_to_ptr.vmem [resolvable:$true] %s19_s26  ;;  %s55_s0 = int_to_ptr.hbm [resolvable:$true] %s54_s0 }
   0x9   :  { %25 = dma.hbm_to_vmem [thread:$0]  %s18_s22, 128, %s20_s26, [#allocation3], %s955_s23, %s955_s23, %s956_s24  }
   0xa   :  { %s958_s5 = smov [#allocation7]   ;;  %s959_s7 = smov [#allocation8]  }
   0xb   :  { %s46_s6 = sshll.u32 %s958_s5, 4  ;;  %s56_s8 = sshll.u32 %s959_s7, 4  ;;  %s47_s6 = int_to_ptr.vmem [resolvable:$true] %s46_s6  ;;  %s57_s8 = int_to_ptr.vmem [resolvable:$true] %s56_s8 }
   0xc   :  { %49 = dma.hbm_to_vmem [thread:$0]  %s45_s1, 128, %s47_s6, [#allocation6]  }
   0xd   :  { %s960_s9 = smov 512   ;;  %s961_s10 = smov 32  }
   0xe   :  { %62 = dma.hbm_to_vmem [thread:$0]  %s55_s0, 3072, %s57_s8, [#allocation9], %s960_s9, %s960_s9, %s961_s10  }
   0xf   :  { %946 = dma.done.wait [#allocation3], 128  }
  0x10   :  { %947 = vsyncadd [#allocation3], 4294967168 }
  0x11   :  { %948 = dma.done.wait [#allocation6], 256  }
  0x12   :  { %949 = vsyncadd [#allocation6], 4294967040 }
  0x13   :  { %950 = dma.done.wait [#allocation9], 3072  }
  0x14   :  { %951 = vsyncadd [#allocation9], 4294964224  ;;  %v708_v0 = vld [vmem:[#allocation8 + $0x40] sm:$0xf]  ;;  %v800_v2 = vld [vmem:[#allocation8 + $0x44] sm:$0xf] }
  0x15   :  { %v804_v1 = vld [vmem:[#allocation8 + $0x5c] sm:$0xf0]  ;;  %v710_v4 = vld [vmem:[#allocation8 + $0x60] sm:$0xf0]  ;;  %v716_v5 = vld [vmem:[#allocation8 + $0x48] sm:$0xf] }
  0x16   :  { %v709_v3 = vor.u32 %v804_v1, %v708_v0  ;;  %v805_v6 = vld [vmem:[#allocation8 + $0x64] sm:$0xf0]  ;;  %v713_v7 = vor.u32 %v800_v2, %v710_v4  ;;  %v801_v9 = vld [vmem:[#allocation8 + $0x4c] sm:$0xf]  ;;  %vm162_vm0 = vcmask 130048   ;;  %s962_s2 = smov [#allocation10]  }
  0x17   :  { %v717_v8 = vor.u32 %v805_v6, %v716_v5  ;;  %v718_v10 = vld [vmem:[#allocation8 + $0x68] sm:$0xf0]  ;;  %v724_v13 = vld [vmem:[#allocation8 + $0x50] sm:$0xf]  ;;  %v802_v15 = vld [vmem:[#allocation8 + $0x54] sm:$0xf] }
  0x18   :  { %v1005_v11 = vld [vmem:[#allocation2] sm:$0xff]  ;;  %173 = vmatpush.bf16.msra.mxu0 %v709_v3  ;;  %v721_v12 = vor.u32 %v801_v9, %v718_v10  ;;  %v806_v14 = vld [vmem:[#allocation8 + $0x6c] sm:$0xf0]  ;;  %187 = vmatpush.bf16.msra.mxu1 %v713_v7  ;;  %v726_v17 = vld [vmem:[#allocation8 + $0x70] sm:$0xf0]  ;;  %s685_s3 = sshll.u32 %s962_s2, 4  ;;  %s686_s3 = int_to_ptr.vmem [resolvable:$true] %s685_s3 }
  0x19   :  { %201 = vmatpush.bf16.msra.mxu2 %v717_v8  ;;  %v725_v16 = vor.u32 %v806_v14, %v724_v13  ;;  %v732_v18 = vld [vmem:[#allocation8 + $0x58] sm:$0xf]  ;;  %v729_v20 = vor.u32 %v802_v15, %v726_v17  ;;  %v803_v22 = vld [vmem:[#allocation8 + $0x5c] sm:$0xf]  ;;  %v748_v24 = vld [vmem:[#allocation8 + $0x80] sm:$0xf] }
  0x1a   :  { %v807_v19 = vld [vmem:[#allocation8 + $0x74] sm:$0xf0]  ;;  %215 = vmatpush.bf16.msra.mxu3 %v721_v12  ;;  %v734_v23 = vld [vmem:[#allocation8 + $0x78] sm:$0xf0]  ;;  %v812_v26 = vld [vmem:[#allocation8 + $0x9c] sm:$0xf0] }
  0x1b   :  { %v733_v21 = vor.u32 %v807_v19, %v732_v18  ;;  %738 = vmatmul.msk.bf16.vlgmr.msra.gmra.mxu0 %vm162_vm0, %v1005_v11  ;;  %v737_v25 = vor.u32 %v803_v22, %v734_v23  ;;  %v808_v27 = vld [vmem:[#allocation8 + $0x84] sm:$0xf]  ;;  %739 = vmatmul.msk.bf16.vlgmr.msra.gmra.mxu1 %vm162_vm0, %v1005_v11  ;;  %v749_v29 = vor.u32 %v812_v26, %v748_v24  ;;  %v756_v31 = vld [vmem:[#allocation8 + $0x88] sm:$0xf]  ;;  %v809_v33 = vld [vmem:[#allocation8 + $0x8c] sm:$0xf] }
  0x1c   :  { %v750_v28 = vld [vmem:[#allocation8 + $0xa0] sm:$0xf0]  ;;  %740 = vmatmul.msk.bf16.vlgmr.msra.gmra.mxu2 %vm162_vm0, %v1005_v11  ;;  %v813_v32 = vld [vmem:[#allocation8 + $0xa4] sm:$0xf0]  ;;  %229 = vmatpush.bf16.msrb.mxu0 %v725_v16  ;;  %v758_v35 = vld [vmem:[#allocation8 + $0xa8] sm:$0xf0] }
  0x1d   :  { %v753_v30 = vor.u32 %v808_v27, %v750_v28  ;;  %741 = vmatmul.msk.bf16.vlgmr.msra.gmra.mxu3 %vm162_vm0, %v1005_v11  ;;  %v757_v34 = vor.u32 %v813_v32, %v756_v31  ;;  %243 = vmatpush.bf16.msrb.mxu1 %v729_v20  ;;  %v761_v36 = vor.u32 %v809_v33, %v758_v35  ;;  %v764_v37 = vld [vmem:[#allocation8 + $0x90] sm:$0xf]  ;;  %v810_v39 = vld [vmem:[#allocation8 + $0x94] sm:$0xf]  ;;  %v772_v41 = vld [vmem:[#allocation8 + $0x98] sm:$0xf] }
  0x1e   :  { %257 = vmatpush.bf16.msrb.mxu2 %v733_v21  ;;  %271 = vmatpush.bf16.msrb.mxu3 %v737_v25  ;;  %v814_v38 = vld [vmem:[#allocation8 + $0xac] sm:$0xf0]  ;;  %v766_v40 = vld [vmem:[#allocation8 + $0xb0] sm:$0xf0]  ;;  %v815_v42 = vld [vmem:[#allocation8 + $0xb4] sm:$0xf0] }
  0x1f   :  { %v811_v43 = vld [vmem:[#allocation8 + $0x9c] sm:$0xf]  ;;  %v765_v45 = vor.u32 %v814_v38, %v764_v37  ;;  %v769_v46 = vor.u32 %v810_v39, %v766_v40  ;;  %v773_v47 = vor.u32 %v815_v42, %v772_v41  ;;  %v799_v9 = vld [vmem:[#allocation5] sm:$0xff]  ;;  %v82_v26 = vld [vmem:[#allocation8] sm:$0xff]  ;;  %s687_s13 = sshll.u32 %s1113_s4, 4  ;;  %s963_s14 = smov 1024   ;;  %s688_s13 = int_to_ptr.hbm [resolvable:$true] %s687_s13 }
  0x20   :  { %350 = vmatpush.bf16.msra.mxu0 %v749_v29  ;;  %v774_v44 = vld [vmem:[#allocation8 + $0xb8] sm:$0xf0]  ;;  %v295_v27 = vld [vmem:[#allocation8 + $0x80] sm:$0xff]  ;;  %v90_v28 = vunpack.c.l.bf16 %v82_v26 }
  0x21   :  { %364 = vmatpush.bf16.msra.mxu1 %v753_v30  ;;  %v777_v48 = vor.u32 %v811_v43, %v774_v44  ;;  %v455_v29 = vunpack.c.l.bf16 %v295_v27  ;;  %v91_v30 = vunpack.c.h.bf16 %v82_v26  ;;  %v1079_v31 = vld [vmem:[#allocation7] sm:$0xff]  ;;  %v456_v32 = vunpack.c.h.bf16 %v295_v27  ;;  %v86_v39 = vld [vmem:[#allocation8 + $0x20] sm:$0xff] }
  0x22   :  { %378 = vmatpush.bf16.msra.mxu2 %v757_v34  ;;  %392 = vmatpush.bf16.msra.mxu3 %v761_v36  ;;  %v633_v36 = vperm.slane %v1079_v31, 0  ;;  %v634_v41 = vperm.slane %v1079_v31, 1  ;;  %v299_v42 = vld [vmem:[#allocation8 + $0xa0] sm:$0xff] }
  0x2b   :  { %742 = vmatmul.msk.bf16.vlgmr.msrb.gmra.mxu0 %vm162_vm0, %v1005_v11  ;;  %743 = vmatmul.msk.bf16.vlgmr.msrb.gmra.mxu1 %vm162_vm0, %v1005_v11 }
  0x2c   :  { %744 = vmatmul.msk.bf16.vlgmr.msrb.gmra.mxu2 %vm162_vm0, %v1005_v11  ;;  %406 = vmatpush.bf16.msrb.mxu0 %v765_v45  ;;  %v98_v45 = vunpack.c.l.bf16 %v86_v39 }
  0x2d   :  { %745 = vmatmul.msk.bf16.vlgmr.msrb.gmra.mxu3 %vm162_vm0, %v1005_v11  ;;  %420 = vmatpush.bf16.msrb.mxu1 %v769_v46 }
  0x2e   :  { %434 = vmatpush.bf16.msrb.mxu2 %v773_v47  ;;  %448 = vmatpush.bf16.msrb.mxu3 %v777_v48  ;;  %v463_v47 = vunpack.c.l.bf16 %v299_v42  ;;  %v83_v48 = vld [vmem:[#allocation8 + $0x8] sm:$0xff] }
  0x3b   :  { %778 = vmatmul.msk.bf16.vlgmr.msra.gmra.mxu0 %vm162_vm0, %v1005_v11  ;;  %779 = vmatmul.msk.bf16.vlgmr.msra.gmra.mxu1 %vm162_vm0, %v1005_v11 }
  0x3c   :  { %780 = vmatmul.msk.bf16.vlgmr.msra.gmra.mxu2 %vm162_vm0, %v1005_v11 }
  0x3d   :  { %781 = vmatmul.msk.bf16.vlgmr.msra.gmra.mxu3 %vm162_vm0, %v1005_v11 }
  0x4b   :  { %782 = vmatmul.msk.bf16.vlgmr.msrb.gmra.mxu0 %vm162_vm0, %v1005_v11  ;;  %783 = vmatmul.msk.bf16.vlgmr.msrb.gmra.mxu1 %vm162_vm0, %v1005_v11 }
  0x4c   :  { %784 = vmatmul.msk.bf16.vlgmr.msrb.gmra.mxu2 %vm162_vm0, %v1005_v11 }
  0x4d   :  { %785 = vmatmul.msk.bf16.vlgmr.msrb.gmra.mxu3 %vm162_vm0, %v1005_v11 }
  0x98   :  { %v1039_v49 = vpop.f32.mrf.mxu0  ;;  %v1041_v50 = vpop.f32.mrf.mxu1 }
  0x99   :  { %v278_v34 = vadd.f32 %v1039_v49, %v90_v28  ;;  %v279_v38 = vadd.f32 %v1041_v50, %v91_v30  ;;  %v464_v49 = vunpack.c.h.bf16 %v299_v42  ;;  %v300_v30 = vld [vmem:[#allocation8 + $0xa8] sm:$0xff]  ;;  %v638_v42 = vperm.slane %v1079_v31, 5 }
  0x9f   :  { %v1043_v51 = vpop.f32.mrf.mxu2 }
  0xa0   :  { %v1045_v52 = vpop.f32.mrf.mxu3  ;;  %v1047_v53 = vpop.f32.mrf.mxu0 }
  0xa1   :  { %v1049_v54 = vpop.f32.mrf.mxu1  ;;  %v286_v50 = vadd.f32 %v1047_v53, %v98_v45 }
  0xa7   :  { %v1051_v55 = vpop.f32.mrf.mxu2 }
  0xa8   :  { %v1053_v56 = vpop.f32.mrf.mxu3  ;;  %v1055_v57 = vpop.f32.mrf.mxu0 }
  0xa9   :  { %v1057_v58 = vpop.f32.mrf.mxu1 }
  0xaf   :  { %v1059_v59 = vpop.f32.mrf.mxu2 }
  0xb0   :  { %v1061_v60 = vpop.f32.mrf.mxu3  ;;  %v1063_v61 = vpop.f32.mrf.mxu0 }
  0xb1   :  { %v1065_v62 = vpop.f32.mrf.mxu1 }
  0xb7   :  { %v1067_v63 = vpop.f32.mrf.mxu2 }
  0xb8   :  { %v1069_v0 = vpop.f32.mrf.mxu3  ;;  %v352_v1 = vpop.f32.mrf.mxu0 }
  0xb9   :  { %v366_v2 = vpop.f32.mrf.mxu1 }
  0xbf   :  { %v380_v3 = vpop.f32.mrf.mxu2 }
  0xc0   :  { %v394_v4 = vpop.f32.mrf.mxu3  ;;  %v354_v5 = vpop.f32.mrf.mxu0 }
  0xc1   :  { %v471_v6 = vpack.c.bf16 %v354_v5, %v352_v1  ;;  %v368_v7 = vpop.f32.mrf.mxu1  ;;  %v99_v1 = vunpack.c.h.bf16 %v86_v39  ;;  %v92_v5 = vunpack.c.l.bf16 %v83_v48 }
  0xc2   :  { %v472_v8 = vpack.c.bf16 %v368_v7, %v366_v2 }
  0xc3   :  { %494 = vmatpush.bf16.msra.mxu0 %v471_v6  ;;  %v84_v6 = vld [vmem:[#allocation8 + $0x10] sm:$0xff] }
  0xc4   :  { %508 = vmatpush.bf16.msra.mxu1 %v472_v8 }
  0xc6   :  { %790 = vmatmul.msk.bf16.vlgmr.msra.gmra.mxu0 %vm162_vm0, %v799_v9 }
  0xc7   :  { %v382_v10 = vpop.f32.mrf.mxu2  ;;  %791 = vmatmul.msk.bf16.vlgmr.msra.gmra.mxu1 %vm162_vm0, %v799_v9 }
  0xc8   :  { %v473_v11 = vpack.c.bf16 %v382_v10, %v380_v3  ;;  %v396_v12 = vpop.f32.mrf.mxu3  ;;  %v408_v13 = vpop.f32.mrf.mxu0  ;;  %v296_v3 = vld [vmem:[#allocation8 + $0x88] sm:$0xff] }
  0xc9   :  { %v474_v14 = vpack.c.bf16 %v396_v12, %v394_v4  ;;  %v422_v15 = vpop.f32.mrf.mxu1  ;;  %v297_v12 = vld [vmem:[#allocation8 + $0x90] sm:$0xff] }
  0xca   :  { %522 = vmatpush.bf16.msra.mxu2 %v473_v11  ;;  %v457_v11 = vunpack.c.l.bf16 %v296_v3  ;;  %v459_v53 = vunpack.c.l.bf16 %v297_v12  ;;  %v460_v26 = vunpack.c.h.bf16 %v297_v12 }
  0xcb   :  { %536 = vmatpush.bf16.msra.mxu3 %v474_v14 }
  0xcd   :  { %792 = vmatmul.msk.bf16.vlgmr.msra.gmra.mxu2 %vm162_vm0, %v799_v9 }
  0xce   :  { %793 = vmatmul.msk.bf16.vlgmr.msra.gmra.mxu3 %vm162_vm0, %v799_v9 }
  0xcf   :  { %v436_v16 = vpop.f32.mrf.mxu2 }
  0xd0   :  { %v450_v17 = vpop.f32.mrf.mxu3  ;;  %v410_v18 = vpop.f32.mrf.mxu0 }
  0xd1   :  { %v475_v19 = vpack.c.bf16 %v410_v18, %v408_v13  ;;  %v424_v20 = vpop.f32.mrf.mxu1  ;;  %v93_v13 = vunpack.c.h.bf16 %v83_v48  ;;  %v280_v18 = vadd.f32 %v1043_v51, %v92_v5  ;;  %v85_v5 = vld [vmem:[#allocation8 + $0x18] sm:$0xff] }
  0xd2   :  { %v476_v21 = vpack.c.bf16 %v424_v20, %v422_v15  ;;  %v458_v15 = vunpack.c.h.bf16 %v296_v3  ;;  %v95_v20 = vunpack.c.h.bf16 %v84_v6 }
  0xd3   :  { %550 = vmatpush.bf16.msrb.mxu0 %v475_v19  ;;  %v87_v19 = vld [vmem:[#allocation8 + $0x28] sm:$0xff]  ;;  %v281_v27 = vadd.f32 %v1045_v52, %v93_v13 }
  0xd4   :  { %564 = vmatpush.bf16.msrb.mxu1 %v476_v21  ;;  %v101_v45 = vunpack.c.h.bf16 %v87_v19 }
  0xd6   :  { %794 = vmatmul.msk.bf16.vlgmr.msrb.gmra.mxu0 %vm162_vm0, %v799_v9 }
  0xd7   :  { %v438_v22 = vpop.f32.mrf.mxu2  ;;  %795 = vmatmul.msk.bf16.vlgmr.msrb.gmra.mxu1 %vm162_vm0, %v799_v9 }
  0xd8   :  { %v477_v23 = vpack.c.bf16 %v438_v22, %v436_v16  ;;  %v452_v24 = vpop.f32.mrf.mxu3  ;;  %v94_v16 = vunpack.c.l.bf16 %v84_v6 }
  0xd9   :  { %v478_v25 = vpack.c.bf16 %v452_v24, %v450_v17 }
  0xda   :  { %578 = vmatpush.bf16.msrb.mxu2 %v477_v23  ;;  %v282_v51 = vadd.f32 %v1055_v57, %v94_v16 }
  0xdb   :  { %592 = vmatpush.bf16.msrb.mxu3 %v478_v25  ;;  %v635_v25 = vperm.slane %v1079_v31, 2 }
  0xdd   :  { %796 = vmatmul.msk.bf16.vlgmr.msrb.gmra.mxu2 %vm162_vm0, %v799_v9 }
  0xde   :  { %797 = vmatmul.msk.bf16.vlgmr.msrb.gmra.mxu3 %vm162_vm0, %v799_v9  ;;  %v287_v9 = vadd.f32 %v1049_v54, %v99_v1 }
 0x143   :  { %v496_v33 = vpop.f32.mrf.mxu0 }
 0x144   :  { %v599_v35 = vsub.f32 %v496_v33, %v455_v29  ;;  %v510_v37 = vpop.f32.mrf.mxu1  ;;  %v636_v29 = vperm.slane %v1079_v31, 3 }
 0x145   :  { %v600_v40 = vsub.f32 %v510_v37, %v456_v32  ;;  %v100_v32 = vunpack.c.l.bf16 %v87_v19 }
 0x146   :  { %v615_v43 = vadd.f32 %v599_v35, %v278_v34  ;;  %v283_v35 = vadd.f32 %v1057_v58, %v95_v20 }
 0x147   :  { %v616_v44 = vadd.f32 %v600_v40, %v279_v38  ;;  %v637_v38 = vperm.slane %v1079_v31, 4  ;;  %v88_v40 = vld [vmem:[#allocation8 + $0x30] sm:$0xff] }
 0x148   :  { %v649_v46 = vadd.f32 %v633_v36, %v615_v43  ;;  %v465_v43 = vunpack.c.l.bf16 %v300_v30  ;;  %v102_v1 = vunpack.c.l.bf16 %v88_v40  ;;  %v103_v58 = vunpack.c.h.bf16 %v88_v40 }
 0x149   :  { %v650_v2 = vadd.f32 %v634_v41, %v616_v44  ;;  %v301_v44 = vld [vmem:[#allocation8 + $0xb0] sm:$0xff] }
 0x14a   :  { %665 = vst [vmem:[#allocation10] sm:$0xff] %v649_v46  ;;  %v467_v3 = vunpack.c.l.bf16 %v301_v44 }
 0x14b   :  { %666 = vst [vmem:[#allocation10 + $0x8] sm:$0xff] %v650_v2  ;;  %v498_v4 = vpop.f32.mrf.mxu0 }
 0x14c   :  { %v607_v7 = vsub.f32 %v498_v4, %v463_v47  ;;  %v512_v8 = vpop.f32.mrf.mxu1  ;;  %v466_v47 = vunpack.c.h.bf16 %v300_v30  ;;  %v288_v4 = vadd.f32 %v1051_v55, %v100_v32  ;;  %v291_v55 = vadd.f32 %v1065_v62, %v103_v58 }
 0x14d   :  { %v608_v10 = vsub.f32 %v512_v8, %v464_v49  ;;  %v468_v8 = vunpack.c.h.bf16 %v301_v44  ;;  %v639_v30 = vperm.slane %v1079_v31, 6 }
 0x14e   :  { %v623_v14 = vadd.f32 %v607_v7, %v286_v50 }
 0x14f   :  { %v624_v17 = vadd.f32 %v608_v10, %v287_v9  ;;  %v289_v9 = vadd.f32 %v1053_v56, %v101_v45 }
 0x150   :  { %v657_v21 = vadd.f32 %v633_v36, %v623_v14  ;;  %v524_v22 = vpop.f32.mrf.mxu2  ;;  %v96_v14 = vunpack.c.l.bf16 %v85_v5 }
 0x151   :  { %v658_v23 = vadd.f32 %v634_v41, %v624_v17  ;;  %v601_v24 = vsub.f32 %v524_v22, %v457_v11  ;;  %v538_v54 = vpop.f32.mrf.mxu3  ;;  %v298_v11 = vld [vmem:[#allocation8 + $0x98] sm:$0xff]  ;;  %v97_v22 = vunpack.c.h.bf16 %v85_v5 }
 0x152   :  { %673 = vst [vmem:[#allocation10 + $0x40] sm:$0xff] %v657_v21  ;;  %v602_v28 = vsub.f32 %v538_v54, %v458_v15  ;;  %v290_v15 = vadd.f32 %v1063_v61, %v102_v1  ;;  %v461_v21 = vunpack.c.l.bf16 %v298_v11 }
 0x153   :  { %674 = vst [vmem:[#allocation10 + $0x48] sm:$0xff] %v658_v23  ;;  %v617_v33 = vadd.f32 %v601_v24, %v280_v18  ;;  %v552_v34 = vpop.f32.mrf.mxu0  ;;  %v462_v23 = vunpack.c.h.bf16 %v298_v11  ;;  %v285_v62 = vadd.f32 %v1061_v60, %v97_v22 }
 0x154   :  { %v618_v36 = vadd.f32 %v602_v28, %v281_v27  ;;  %v603_v37 = vsub.f32 %v552_v34, %v459_v53  ;;  %v566_v39 = vpop.f32.mrf.mxu1  ;;  %v284_v27 = vadd.f32 %v1059_v59, %v96_v14 }
 0x155   :  { %v651_v52 = vadd.f32 %v635_v25, %v617_v33  ;;  %v604_v41 = vsub.f32 %v566_v39, %v460_v26  ;;  %v302_v33 = vld [vmem:[#allocation8 + $0xb8] sm:$0xff] }
 0x156   :  { %v652_v46 = vadd.f32 %v636_v29, %v618_v36  ;;  %v619_v57 = vadd.f32 %v603_v37, %v282_v51  ;;  %v470_v40 = vunpack.c.h.bf16 %v302_v33 }
 0x157   :  { %667 = vst [vmem:[#allocation10 + $0x10] sm:$0xff] %v651_v52  ;;  %v620_v48 = vadd.f32 %v604_v41, %v283_v35 }
 0x158   :  { %668 = vst [vmem:[#allocation10 + $0x18] sm:$0xff] %v652_v46  ;;  %v653_v2 = vadd.f32 %v637_v38, %v619_v57  ;;  %v526_v49 = vpop.f32.mrf.mxu2 }
 0x159   :  { %v654_v50 = vadd.f32 %v638_v42, %v620_v48  ;;  %v609_v6 = vsub.f32 %v526_v49, %v465_v43  ;;  %v540_v7 = vpop.f32.mrf.mxu3 }
 0x15a   :  { %669 = vst [vmem:[#allocation10 + $0x20] sm:$0xff] %v653_v2  ;;  %v610_v10 = vsub.f32 %v540_v7, %v466_v47 }
 0x15b   :  { %670 = vst [vmem:[#allocation10 + $0x28] sm:$0xff] %v654_v50  ;;  %v625_v12 = vadd.f32 %v609_v6, %v288_v4  ;;  %v554_v13 = vpop.f32.mrf.mxu0 }
 0x15c   :  { %v626_v16 = vadd.f32 %v610_v10, %v289_v9  ;;  %v611_v17 = vsub.f32 %v554_v13, %v467_v3  ;;  %v568_v18 = vpop.f32.mrf.mxu1 }
 0x15d   :  { %v659_v19 = vadd.f32 %v635_v25, %v625_v12  ;;  %v612_v20 = vsub.f32 %v568_v18, %v468_v8  ;;  %v89_v25 = vld [vmem:[#allocation8 + $0x38] sm:$0xff] }
 0x15e   :  { %v660_v53 = vadd.f32 %v636_v29, %v626_v16  ;;  %v627_v56 = vadd.f32 %v611_v17, %v290_v15  ;;  %v640_v29 = vperm.slane %v1079_v31, 7  ;;  %v104_v36 = vunpack.c.l.bf16 %v89_v25 }
 0x15f   :  { %675 = vst [vmem:[#allocation10 + $0x50] sm:$0xff] %v659_v19  ;;  %v628_v24 = vadd.f32 %v612_v20, %v291_v55  ;;  %v105_v59 = vunpack.c.h.bf16 %v89_v25 }
 0x160   :  { %676 = vst [vmem:[#allocation10 + $0x58] sm:$0xff] %v660_v53  ;;  %v661_v54 = vadd.f32 %v637_v38, %v627_v56  ;;  %v580_v26 = vpop.f32.mrf.mxu2  ;;  %v469_v38 = vunpack.c.l.bf16 %v302_v33  ;;  %v292_v60 = vadd.f32 %v1067_v63, %v104_v36 }
 0x161   :  { %v662_v61 = vadd.f32 %v638_v42, %v628_v24  ;;  %v605_v28 = vsub.f32 %v580_v26, %v461_v21  ;;  %v594_v32 = vpop.f32.mrf.mxu3  ;;  %v293_v43 = vadd.f32 %v1069_v0, %v105_v59 }
 0x162   :  { %677 = vst [vmem:[#allocation10 + $0x60] sm:$0xff] %v661_v54  ;;  %v606_v51 = vsub.f32 %v594_v32, %v462_v23 }
 0x163   :  { %678 = vst [vmem:[#allocation10 + $0x68] sm:$0xff] %v662_v61  ;;  %v621_v34 = vadd.f32 %v605_v28, %v284_v27 }
 0x164   :  { %v622_v35 = vadd.f32 %v606_v51, %v285_v62 }
 0x165   :  { %v655_v37 = vadd.f32 %v639_v30, %v621_v34 }
 0x166   :  { %v656_v39 = vadd.f32 %v640_v29, %v622_v35 }
 0x167   :  { %671 = vst [vmem:[#allocation10 + $0x30] sm:$0xff] %v655_v37 }
 0x168   :  { %672 = vst [vmem:[#allocation10 + $0x38] sm:$0xff] %v656_v39  ;;  %v582_v52 = vpop.f32.mrf.mxu2 }
 0x169   :  { %v613_v41 = vsub.f32 %v582_v52, %v469_v38  ;;  %v596_v42 = vpop.f32.mrf.mxu3 }
 0x16a   :  { %v614_v31 = vsub.f32 %v596_v42, %v470_v40 }
 0x16b   :  { %v629_v44 = vadd.f32 %v613_v41, %v292_v60 }
 0x16c   :  { %v630_v45 = vadd.f32 %v614_v31, %v293_v43 }
 0x16d   :  { %v663_v46 = vadd.f32 %v639_v30, %v629_v44 }
 0x16e   :  { %v664_v57 = vadd.f32 %v640_v29, %v630_v45 }
 0x16f   :  { %679 = vst [vmem:[#allocation10 + $0x70] sm:$0xff] %v663_v46 }
 0x170   :  { %680 = vst [vmem:[#allocation10 + $0x78] sm:$0xff] %v664_v57 }
 0x171   :  { %693 = dma.vmem_to_hbm [thread:$0]  %s686_s3, 2048, %s688_s13, [#allocation4], %s963_s14, %s963_s14, %s955_s23  }
 0x172   :  { %952 = dma.done.wait [#allocation4], 2048  }
 0x173   :  { %953 = vsyncadd [#allocation4], 4294965248 }
 0x174   :  { %698 = vsyncpa [#allocation3], 1 }
 0x175   :  { %699 = vsyncpa [#allocation6], 1 }
 0x176   :  { %700 = vsyncpa [#allocation9], 1 }
 0x177   :  { %701 = vsyncpa [#allocation4], 1 }

</bundles_post_ra>
